<compile_context>
chip_gen: v5e
topology: v5e:2x2
jax: 0.10.0
libtpu: 0.0.40
codegen_flags: <defaults>
</compile_context>

<pallas_src>
import functools

import jax
import jax.numpy as jnp
from jax.experimental import pallas as pl
from jax.experimental.pallas import tpu as pltpu

_LANES = 128
_DEFAULT_TILE_ROWS = 256  # 256*128*4B = 128 KiB per example per input block


def _dice_loss_kernel(x_ref, t_ref, o_ref, inter_acc, sum_acc, *, n_true):
    step = pl.program_id(0)

    @pl.when(step == 0)
    def _init():
        inter_acc[...] = jnp.zeros_like(inter_acc)
        sum_acc[...] = jnp.zeros_like(sum_acc)

    # Cast narrow dtypes to f32 on load; accumulate in f32. Pure VPU work that
    # hides entirely under the HBM->VMEM DMA for this memory-bound kernel.
    x = x_ref[...].astype(jnp.float32)
    t = t_ref[...].astype(jnp.float32)
    inter_acc[...] += x * t          # partial intersection, element-wise
    sum_acc[...] += x + t            # partial (input_sum + target_sum)

    @pl.when(step == pl.num_programs(0) - 1)
    def _finalize():
        smooth = jnp.float32(1.0)
        # Cross-lane / cross-sublane reductions + divide run exactly once.
        inter = jnp.sum(jnp.sum(inter_acc[...], axis=2), axis=1, keepdims=True)  # (N, 1)
        tot = jnp.sum(jnp.sum(sum_acc[...], axis=2), axis=1, keepdims=True)      # (N, 1)
        dice = (2.0 * inter + smooth) / (tot + smooth)                           # (N, 1)
        loss = 1.0 - jnp.sum(dice, axis=0, keepdims=True) / jnp.float32(n_true)  # (1, 1)
        o_ref[...] = loss.astype(jnp.float32)


def _sublane_multiple(dtype):
    # f32 -> 8, bf16 -> 16, int8/fp8 -> 32 (sublane packing of narrow dtypes).
    return 8 * max(1, 4 // jnp.dtype(dtype).itemsize)


def binary_dice_loss(inputs, targets, *, tile_rows=_DEFAULT_TILE_ROWS):
    """Pallas TPU implementation of BinaryDiceLoss.forward.

    inputs/targets: same batch dim N, any trailing shape (flattened per example).
    Inputs are passed in their native dtype; the kernel casts to f32 on load.
    Returns a scalar float32 loss.
    """
    n = targets.shape[0]
    x = inputs.reshape(n, -1)
    t = targets.reshape(n, -1)
    m = x.shape[1]

    sub = max(_sublane_multiple(x.dtype), _sublane_multiple(t.dtype))

    rows = pl.cdiv(m, _LANES)  # 128-lane rows per example
    # Keep the per-tile VMEM footprint modest so double-buffering of both
    # inputs + the two f32 accumulators fits every generation's scoped VMEM
    # default (v5e 16 MiB, v7x 32 MiB of 64 MiB physical).
    budget_rows = max(sub, (((1 << 20) // (n * _LANES * 4)) // sub) * sub)
    tile_rows = max(sub, min(int(tile_rows), budget_rows, ((rows + sub - 1) // sub) * sub))
    tile_rows = ((tile_rows + sub - 1) // sub) * sub

    rows_pad = ((rows + tile_rows - 1) // tile_rows) * tile_rows
    m_pad = rows_pad * _LANES
    if m_pad != m:
        # Zero padding is exact: contributes 0 to all three sums.
        x = jnp.pad(x, ((0, 0), (0, m_pad - m)))
        t = jnp.pad(t, ((0, 0), (0, m_pad - m)))

    x3 = x.reshape(n, rows_pad, _LANES)
    t3 = t.reshape(n, rows_pad, _LANES)
    num_tiles = rows_pad // tile_rows

    kernel = functools.partial(_dice_loss_kernel, n_true=n)

    bytes_accessed = int(x3.size * x3.dtype.itemsize + t3.size * t3.dtype.itemsize + 4)
    cost = pl.CostEstimate(
        flops=4 * n * m_pad, transcendentals=0, bytes_accessed=bytes_accessed
    )

    out = pl.pallas_call(
        kernel,
        out_shape=jax.ShapeDtypeStruct((1, 1), jnp.float32),
        grid_spec=pltpu.PrefetchScalarGridSpec(
            num_scalar_prefetch=0,
            grid=(num_tiles,),  # reduction over feature-row tiles
            in_specs=[
                pl.BlockSpec((n, tile_rows, _LANES), lambda i: (0, i, 0)),
                pl.BlockSpec((n, tile_rows, _LANES), lambda i: (0, i, 0)),
            ],
            out_specs=pl.BlockSpec((1, 1), lambda i: (0, 0)),
            scratch_shapes=[
                pltpu.VMEM((n, tile_rows, _LANES), jnp.float32),  # intersection acc
                pltpu.VMEM((n, tile_rows, _LANES), jnp.float32),  # x_sum + t_sum acc
            ],
        ),
        compiler_params=pltpu.CompilerParams(
            dimension_semantics=("arbitrary",),
        ),
        cost_estimate=cost,
    )(x3, t3)
    return out[0, 0]


def _reference_dice_loss(inputs, targets):
    # Pure-JAX reference mirroring the PyTorch module exactly.
    n = targets.shape[0]
    smooth = 1.0
    x = inputs.reshape(n, -1).astype(jnp.float32)
    t = targets.reshape(n, -1).astype(jnp.float32)
    inter = (x * t).sum(axis=1)
    dice = (2.0 * inter + smooth) / (x.sum(axis=1) + t.sum(axis=1) + smooth)
    return 1.0 - dice.sum() / n


if __name__ == "__main__":
    key = jax.random.PRNGKey(0)
    k1, k2, k3, k4 = jax.random.split(key, 4)

    # Primary case: N=2, C=4, H=W=16 (single tile).
    x = jax.nn.sigmoid(jax.random.normal(k1, (2, 4, 16, 16), dtype=jnp.float32))
    y = (jax.random.uniform(k2, (2, 4, 16, 16)) > 0.5).astype(jnp.float32)
    loss = binary_dice_loss(x, y)
    jax.block_until_ready(loss)
    ref = _reference_dice_loss(x, y)
    assert jnp.allclose(loss, ref, atol=1e-5, rtol=1e-5), (loss, ref)

    # Multi-tile path (grid > 1): force a small tile so the accumulator pattern
    # runs over several pipelined grid steps.
    x2 = jax.nn.sigmoid(jax.random.normal(k3, (2, 4, 32, 32), dtype=jnp.float32))
    y2 = (jax.random.uniform(k4, (2, 4, 32, 32)) > 0.5).astype(jnp.float32)
    loss2 = binary_dice_loss(x2, y2, tile_rows=8)
    jax.block_until_ready(loss2)
    ref2 = _reference_dice_loss(x2, y2)
    assert jnp.allclose(loss2, ref2, atol=1e-5, rtol=1e-5), (loss2, ref2)

    # Padding path: feature size not a multiple of 128.
    x3 = jax.nn.sigmoid(jax.random.normal(k1, (2, 3, 17, 19), dtype=jnp.float32))
    y3 = (jax.random.uniform(k2, (2, 3, 17, 19)) > 0.5).astype(jnp.float32)
    loss3 = binary_dice_loss(x3, y3)
    jax.block_until_ready(loss3)
    ref3 = _reference_dice_loss(x3, y3)
    assert jnp.allclose(loss3, ref3, atol=1e-5, rtol=1e-5), (loss3, ref3)

    print("KERNEL_OK")
</pallas_src>

<mosaic_0001>
module attributes {stable_mosaic.version = 11 : i64} {
  func.func @_dice_loss_kernel(%arg0: i32, %arg1: memref<2x8x128xf32, #tpu.memory_space<vmem>>, %arg2: memref<2x8x128xf32, #tpu.memory_space<vmem>>, %arg3: memref<1x1xf32, #tpu.memory_space<vmem>>, %arg4: memref<2x8x128xf32, #tpu.memory_space<vmem>>, %arg5: memref<2x8x128xf32, #tpu.memory_space<vmem>>) attributes {dimension_semantics = [#tpu.dimension_semantics<arbitrary>], iteration_bounds = array<i64: 1>, scalar_prefetch = 0 : i64, scratch_operands = 2 : i64, tpu.core_type = #tpu.core_type<tc>, window_params = [{transform_indices = @transform_0, window_bounds = array<i64: 2, 8, 128>}, {transform_indices = @transform_1, window_bounds = array<i64: 2, 8, 128>}, {pipeline_mode = #tpu.pipeline_mode<synchronous>, transform_indices = @transform_2, window_bounds = array<i64: 1, 1>}]} {
    %c0_i32 = arith.constant 0 : i32
    %0 = arith.cmpi eq, %arg0, %c0_i32 : i32
    %1 = arith.extui %0 : i1 to i32
    %c0_i32_0 = arith.constant 0 : i32
    %2 = arith.cmpi ne, %1, %c0_i32_0 : i32
    scf.if %2 {
      %cst = arith.constant 0.000000e+00 : f32
      %16 = vector.broadcast %cst : f32 to vector<2x8x128xf32>
      %c0_20 = arith.constant 0 : index
      %c0_21 = arith.constant 0 : index
      %c0_22 = arith.constant 0 : index
      %17 = vector.load %arg4[%c0_20, %c0_21, %c0_22] : memref<2x8x128xf32, #tpu.memory_space<vmem>>, vector<2x8x128xf32>
      tpu.vector_store %arg4[%c0_20, %c0_21, %c0_22], %16 {strides = array<i32>} : memref<2x8x128xf32, #tpu.memory_space<vmem>>, vector<2x8x128xf32>,
      %cst_23 = arith.constant 0.000000e+00 : f32
      %18 = vector.broadcast %cst_23 : f32 to vector<2x8x128xf32>
      %c0_24 = arith.constant 0 : index
      %c0_25 = arith.constant 0 : index
      %c0_26 = arith.constant 0 : index
      %19 = vector.load %arg5[%c0_24, %c0_25, %c0_26] : memref<2x8x128xf32, #tpu.memory_space<vmem>>, vector<2x8x128xf32>
      tpu.vector_store %arg5[%c0_24, %c0_25, %c0_26], %18 {strides = array<i32>} : memref<2x8x128xf32, #tpu.memory_space<vmem>>, vector<2x8x128xf32>,
    } else {
    }
    %c0 = arith.constant 0 : index
    %c0_1 = arith.constant 0 : index
    %c0_2 = arith.constant 0 : index
    %3 = vector.load %arg1[%c0, %c0_1, %c0_2] : memref<2x8x128xf32, #tpu.memory_space<vmem>>, vector<2x8x128xf32>
    %c0_3 = arith.constant 0 : index
    %c0_4 = arith.constant 0 : index
    %c0_5 = arith.constant 0 : index
    %4 = vector.load %arg2[%c0_3, %c0_4, %c0_5] : memref<2x8x128xf32, #tpu.memory_space<vmem>>, vector<2x8x128xf32>
    %c0_6 = arith.constant 0 : index
    %c0_7 = arith.constant 0 : index
    %c0_8 = arith.constant 0 : index
    %5 = vector.load %arg4[%c0_6, %c0_7, %c0_8] : memref<2x8x128xf32, #tpu.memory_space<vmem>>, vector<2x8x128xf32>
    %6 = arith.mulf %3, %4 : vector<2x8x128xf32>
    %7 = arith.addf %5, %6 : vector<2x8x128xf32>
    %c0_9 = arith.constant 0 : index
    %c0_10 = arith.constant 0 : index
    %c0_11 = arith.constant 0 : index
    %8 = vector.load %arg4[%c0_9, %c0_10, %c0_11] : memref<2x8x128xf32, #tpu.memory_space<vmem>>, vector<2x8x128xf32>
    tpu.vector_store %arg4[%c0_9, %c0_10, %c0_11], %7 {strides = array<i32>} : memref<2x8x128xf32, #tpu.memory_space<vmem>>, vector<2x8x128xf32>,
    %c0_12 = arith.constant 0 : index
    %c0_13 = arith.constant 0 : index
    %c0_14 = arith.constant 0 : index
    %9 = vector.load %arg5[%c0_12, %c0_13, %c0_14] : memref<2x8x128xf32, #tpu.memory_space<vmem>>, vector<2x8x128xf32>
    %10 = arith.addf %3, %4 : vector<2x8x128xf32>
    %11 = arith.addf %9, %10 : vector<2x8x128xf32>
    %c0_15 = arith.constant 0 : index
    %c0_16 = arith.constant 0 : index
    %c0_17 = arith.constant 0 : index
    %12 = vector.load %arg5[%c0_15, %c0_16, %c0_17] : memref<2x8x128xf32, #tpu.memory_space<vmem>>, vector<2x8x128xf32>
    tpu.vector_store %arg5[%c0_15, %c0_16, %c0_17], %11 {strides = array<i32>} : memref<2x8x128xf32, #tpu.memory_space<vmem>>, vector<2x8x128xf32>,
    %c0_i32_18 = arith.constant 0 : i32
    %13 = arith.cmpi eq, %arg0, %c0_i32_18 : i32
    %14 = arith.extui %13 : i1 to i32
    %c0_i32_19 = arith.constant 0 : i32
    %15 = arith.cmpi ne, %14, %c0_i32_19 : i32
    scf.if %15 {
      %c0_20 = arith.constant 0 : index
      %c0_21 = arith.constant 0 : index
      %c0_22 = arith.constant 0 : index
      %16 = vector.load %arg4[%c0_20, %c0_21, %c0_22] : memref<2x8x128xf32, #tpu.memory_space<vmem>>, vector<2x8x128xf32>
      %cst = arith.constant dense<0.000000e+00> : vector<2x8xf32>
      %17 = vector.multi_reduction <add>, %16, %cst [2] : vector<2x8x128xf32> to vector<2x8xf32>
      %cst_23 = arith.constant dense<0.000000e+00> : vector<2xf32>
      %18 = vector.multi_reduction <add>, %17, %cst_23 [1] : vector<2x8xf32> to vector<2xf32>
      %19 = vector.shape_cast %18 : vector<2xf32> to vector<2x1xf32>
      %c0_24 = arith.constant 0 : index
      %c0_25 = arith.constant 0 : index
      %c0_26 = arith.constant 0 : index
      %20 = vector.load %arg5[%c0_24, %c0_25, %c0_26] : memref<2x8x128xf32, #tpu.memory_space<vmem>>, vector<2x8x128xf32>
      %cst_27 = arith.constant dense<0.000000e+00> : vector<2x8xf32>
      %21 = vector.multi_reduction <add>, %20, %cst_27 [2] : vector<2x8x128xf32> to vector<2x8xf32>
      %cst_28 = arith.constant dense<0.000000e+00> : vector<2xf32>
      %22 = vector.multi_reduction <add>, %21, %cst_28 [1] : vector<2x8xf32> to vector<2xf32>
      %23 = vector.shape_cast %22 : vector<2xf32> to vector<2x1xf32>
      %cst_29 = arith.constant 2.000000e+00 : f32
      %24 = vector.broadcast %cst_29 : f32 to vector<2x1xf32>
      %25 = arith.mulf %24, %19 : vector<2x1xf32>
      %cst_30 = arith.constant 1.000000e+00 : f32
      %26 = vector.broadcast %cst_30 : f32 to vector<2x1xf32>
      %27 = arith.addf %25, %26 : vector<2x1xf32>
      %cst_31 = arith.constant 1.000000e+00 : f32
      %28 = vector.broadcast %cst_31 : f32 to vector<2x1xf32>
      %29 = arith.addf %23, %28 : vector<2x1xf32>
      %30 = arith.divf %27, %29 : vector<2x1xf32>
      %cst_32 = arith.constant dense<0.000000e+00> : vector<1xf32>
      %31 = vector.multi_reduction <add>, %30, %cst_32 [0] : vector<2x1xf32> to vector<1xf32>
      %32 = vector.shape_cast %31 : vector<1xf32> to vector<1x1xf32>
      %cst_33 = arith.constant 2.000000e+00 : f32
      %33 = vector.broadcast %cst_33 : f32 to vector<1x1xf32>
      %34 = arith.divf %32, %33 : vector<1x1xf32>
      %cst_34 = arith.constant 1.000000e+00 : f32
      %35 = vector.broadcast %cst_34 : f32 to vector<1x1xf32>
      %36 = arith.subf %35, %34 : vector<1x1xf32>
      %c0_35 = arith.constant 0 : index
      %c0_36 = arith.constant 0 : index
      %37 = vector.load %arg3[%c0_35, %c0_36] : memref<1x1xf32, #tpu.memory_space<vmem>>, vector<1x1xf32>
      tpu.vector_store %arg3[%c0_35, %c0_36], %36 {strides = array<i32>} : memref<1x1xf32, #tpu.memory_space<vmem>>, vector<1x1xf32>,
    } else {
    }
    return
  }
  func.func @transform_0(%arg0: i32) -> (i32, i32, i32) {
    %c0_i32 = arith.constant 0 : i32
    %c0_i32_0 = arith.constant 0 : i32
    %c0_i32_1 = arith.constant 0 : i32
    return %c0_i32, %arg0, %c0_i32_0 : i32, i32, i32
  }
  func.func @transform_1(%arg0: i32) -> (i32, i32, i32) {
    %c0_i32 = arith.constant 0 : i32
    %c0_i32_0 = arith.constant 0 : i32
    %c0_i32_1 = arith.constant 0 : i32
    return %c0_i32, %arg0, %c0_i32_0 : i32, i32, i32
  }
  func.func @transform_2(%arg0: i32) -> (i32, i32) {
    %c0_i32 = arith.constant 0 : i32
    %c0_i32_0 = arith.constant 0 : i32
    %c0_i32_1 = arith.constant 0 : i32
    return %c0_i32, %c0_i32_0 : i32, i32
  }
}

</mosaic_0001>

<bundles_post_ra>
// kernel: tpu_custom_call.1
= control target key start
LH: loop header
LB: loop body
LE: loop exit
PB: predicated region body
PF: predicated region fallthrough
CT: control target
= control target key end

     0   :  { %7 = vsyncpa [#allocation5], 0  ;;  %s282_s0 = inlined_call_operand.hbm [shape: f32[2,8,128], index: 0, kind: input, shape index: {}]   ;;  %s283_s1 = inlined_call_operand.hbm [shape: f32[2,8,128], index: 1, kind: input, shape index: {}]   ;;  %s284_s2 = inlined_call_operand.hbm [shape: f32[1,1], index: 2, kind: output, shape index: {}]  }
   0x1   :  { %8 = vsyncpa [#allocation8], 0 }
   0x2   :  { %9 = vsyncpa [#allocation6], 0  ;;  %s14_s11 = sshll.u32 %s282_s0, 4  ;;  %s252_s12 = smov [#allocation4]   ;;  %s15_s11 = int_to_ptr.hbm [resolvable:$true] %s14_s11 }
   0x3   :  { %s16_s13 = sshll.u32 %s252_s12, 4  ;;  %s27_s16 = sshll.u32 %s283_s1, 4  ;;  %s17_s13 = int_to_ptr.vmem [resolvable:$true] %s16_s13  ;;  %s28_s16 = int_to_ptr.hbm [resolvable:$true] %s27_s16 }
   0x4   :  { %s253_s17 = smov 128   ;;  %s254_s18 = smov 8  }
   0x5   :  { %22 = dma.hbm_to_vmem [thread:$0]  %s15_s11, 256, %s17_s13, [#allocation5], %s253_s17, %s253_s17, %s254_s18  }
   0x6   :  { %s255_s19 = smov [#allocation7]  }
   0x7   :  { %s29_s20 = sshll.u32 %s255_s19, 4  ;;  %s30_s20 = int_to_ptr.vmem [resolvable:$true] %s29_s20 }
   0x8   :  { %35 = dma.hbm_to_vmem [thread:$0]  %s28_s16, 256, %s30_s20, [#allocation8], %s253_s17, %s253_s17, %s254_s18  }
   0x9   :  { %246 = dma.done.wait [#allocation5], 256  }
   0xa   :  { %247 = vsyncadd [#allocation5], 4294967040 }
   0xb   :  { %248 = dma.done.wait [#allocation8], 256  }
   0xc   :  { %249 = vsyncadd [#allocation8], 4294967040  ;;  %v52_v0 = vld [vmem:[#allocation4] sm:$0xff]  ;;  %v54_v1 = vld [vmem:[#allocation7] sm:$0xff]  ;;  %v83_v10 = vlaneseq  ;;  %vm87_vm0 = vcmask 1041409   ;;  %vm90_vm1 = vcmask 58368  }
   0xd   :  { %v66_v2 = vadd.f32 %v54_v1, %v52_v0  ;;  %v58_v3 = vmul.f32 %v54_v1, %v52_v0  ;;  %v53_v4 = vld [vmem:[#allocation4 + $0x8] sm:$0xff]  ;;  %v55_v5 = vld [vmem:[#allocation7 + $0x8] sm:$0xff]  ;;  %v256_v24 = vmov 2.0   ;;  %vm127_vm6 = vcmask 1041408   ;;  %s257_s0 = smov [#allocation9]   ;;  %s153_s23 = sshll.u32 %s284_s2, 4  ;;  %s154_s23 = int_to_ptr.hbm [resolvable:$true] %s153_s23 }
   0xe   :  { %v67_v6 = vadd.f32 %v55_v5, %v53_v4  ;;  %v59_v7 = vmul.f32 %v55_v5, %v53_v4  ;;  %v84_v11 = vand.u32 127, %v83_v10  ;;  %s151_s1 = sshll.u32 %s257_s0, 4  ;;  %vm144_vm8 = vcmask 0   ;;  %s152_s1 = int_to_ptr.vmem [resolvable:$true] %s151_s1 }
   0xf   :  { %96 = vadd.xlane.f32.xlu0 %v66_v2  ;;  %77 = vadd.xlane.f32.xlu1 %v58_v3 }
  0x17   :  { %98 = vadd.xlane.f32.xlu0 %v67_v6  ;;  %79 = vadd.xlane.f32.xlu1 %v59_v7 }
  0x82   :  { %v97_v8 = vpop.xlane.xlu0 %96  ;;  %v78_v9 = vpop.xlane.xlu1 %77 }
  0x83   :  { %v102_v14 = vperm.slane %v97_v8, %v84_v11  ;;  %v85_v16 = vperm.slane %v78_v9, %v84_v11 }
  0x8a   :  { %v99_v12 = vpop.xlane.xlu0 %98  ;;  %v80_v13 = vpop.xlane.xlu1 %79 }
  0x8b   :  { %v103_v15 = vperm.slane %v99_v12, %v84_v11  ;;  %v86_v18 = vperm.slane %v80_v13, %v84_v11 }
  0x8d   :  { %v104_v17 = vsel %vm87_vm0, %v103_v15, %v102_v14  ;;  %v88_v20 = vsel %vm87_vm0, %v86_v18, %v85_v16 }
  0x8e   :  { %v106_v19 = vsel %vm90_vm1, %v104_v17, 0.0  ;;  %v91_v21 = vsel %vm90_vm1, %v88_v20, 0.0 }
  0x8f   :  { %107 = vadd.xlane.f32.xlu2 %v106_v19 }
  0x97   :  { %92 = vadd.xlane.f32.xlu2 %v91_v21 }
 0x102   :  { %v108_v22 = vpop.xlane.xlu2 %107 }
 0x103   :  { %v111_v23 = vadd.f32 1.0, %v108_v22 }
 0x105   :  { %170 = vrcp.f32 %v111_v23  ;;  %v123_v30 = vand.u32 2147483648, %v111_v23  ;;  %v121_v32 = vand.u32 2147483647, %v111_v23  ;;  %vm117_vm3 = vweird.f32 %v111_v23 }
 0x106   :  { %172 = vrcp.f32 %v256_v24 }
 0x107   :  { %v124_v36 = vor.u32 1.1754944e-38, %v123_v30  ;;  %vm122_vm5 = vcmp.eq.f32.partialorder %v121_v32, 8.507059e+37 }
 0x10a   :  { %v93_v27 = vpop.xlane.xlu2 %92 }
 0x10b   :  { %v171_v25 = vpop.eup %170  ;;  %v109_v33 = vmul.f32 2.0, %v93_v27 }
 0x10c   :  { %v113_v26 = vmul.f32 %v171_v25, %v111_v23  ;;  %v173_v29 = vpop.eup %172  ;;  %vm118_vm2 = vweird.f32 %v171_v25 }
 0x10d   :  { %v136_v35 = vmul.f32 2.0, %v173_v29  ;;  %vm119_vm4 = vmor %vm117_vm3, %vm118_vm2  ;;  %v110_v38 = vadd.f32 1.0, %v109_v33  ;;  %vm140_vm7 = vweird.f32 %v173_v29 }
 0x10e   :  { %v114_v28 = vsub.f32 1.0, %v113_v26 }
 0x10f   :  { %v137_v41 = vsub.f32 1.0, %v136_v35 }
 0x110   :  { %v115_v31 = vmul.f32 %v171_v25, %v114_v28 }
 0x111   :  { %v138_v44 = vmul.f32 %v173_v29, %v137_v41 }
 0x112   :  { %v116_v34 = vadd.f32 %v171_v25, %v115_v31 }
 0x113   :  { %v139_v47 = vadd.f32 %v173_v29, %v138_v44 }
 0x114   :  { %v120_v37 = vsel %vm119_vm4, %v171_v25, %v116_v34 }
 0x115   :  { %v125_v39 = vsel %vm122_vm5, %v124_v36, %v120_v37  ;;  %v141_v50 = vsel %vm140_vm7, %v173_v29, %v139_v47 }
 0x116   :  { %v126_v40 = vmul.f32 %v125_v39, %v110_v38 }
 0x118   :  { %v128_v42 = vsel %vm127_vm6, %v126_v40, 0.0 }
 0x119   :  { %v129_v43 = vrot.slane %v128_v42, 4 }
 0x11b   :  { %v130_v45 = vadd.f32 %v129_v43, %v128_v42 }
 0x11d   :  { %v131_v46 = vrot.slane %v130_v45, 2 }
 0x11f   :  { %v132_v48 = vadd.f32 %v131_v46, %v130_v45 }
 0x121   :  { %v133_v49 = vrot.slane %v132_v48, 1 }
 0x123   :  { %v134_v51 = vadd.f32 %v133_v49, %v132_v48 }
 0x125   :  { %v142_v52 = vmul.f32 %v141_v50, %v134_v51 }
 0x127   :  { %v143_v53 = vsub.f32 1.0, %v142_v52 }
 0x129   :  { %145 = vst.msk [vmem:[#allocation9] sm:$0x1] %vm144_vm8, %v143_v53 }
 0x12a   :  { %156 = dma.vmem_to_hbm [thread:$0]  %s152_s1, 16, %s154_s23, [#allocation6]  }
 0x12b   :  { %250 = dma.done.wait [#allocation6], 16  }
 0x12c   :  { %251 = vsyncadd [#allocation6], 4294967280 }
 0x12d   :  { %161 = vsyncpa [#allocation5], 1 }
 0x12e   :  { %162 = vsyncpa [#allocation8], 1 }
 0x12f   :  { %163 = vsyncpa [#allocation6], 1 }

</bundles_post_ra>
